<compile_context>
chip_gen: v6e
topology: v6e:2x2x1
jax: 0.10.0
libtpu: 0.0.40
codegen_flags: <defaults>
</compile_context>

<pallas_src>
import functools

import jax
import jax.numpy as jnp
from jax import lax
from jax.experimental import pallas as pl
from jax.experimental.pallas import tpu as pltpu

K = 7            # kernel_size
PAD = 3          # "same" padding for kernel 7
_MAX_BLOCK_BYTES = 4 * 1024 * 1024   # target per-buffer stage-1 block size


def _vmem_limit_bytes():
    """Generation-aware scoped-VMEM budget: ~70% of physical, clamped 32..96 MiB."""
    try:
        cap = int(pltpu.get_tpu_info().vmem_capacity_bytes)
    except Exception:
        cap = 64 * 1024 * 1024
    return max(32 * 1024 * 1024, min(int(cap * 0.7), 96 * 1024 * 1024))


_VMEM_LIMIT = _vmem_limit_bytes()


def _pick_tiles(C, HW, itemsize):
    """Choose (channel chunk, HW lane tile) so one input block is ~<= 4 MiB."""
    chunk = C if C <= 256 else 256
    if HW % 128 != 0:
        # Lane axis must be the full dim; bound the block via the chunk instead.
        max_chunk = max(8, (_MAX_BLOCK_BYTES // (HW * itemsize)) // 8 * 8)
        if C > max_chunk and chunk > max_chunk:
            chunk = max_chunk
        return chunk, HW
    max_lanes = max(512, (_MAX_BLOCK_BYTES // (chunk * itemsize)) // 128 * 128)
    if HW <= max_lanes:
        return chunk, HW
    tile = max_lanes
    while tile >= 128 and HW % tile != 0:   # prefer a dividing tile (lane-dense edges)
        tile -= 128
    if tile < 128:
        tile = max_lanes                    # non-divisor fallback; Pallas masks the edge block
    return chunk, tile


def _reduce_kernel(x_ref, f_ref, *, chunk, tail, slab):
    """Accumulate channel sum (row 0) and channel max (row 1) over C chunks.

    Lane-dense over one H*W tile.  Dense (slab, TILE_HW) elementwise running
    accumulators across sublane slabs; one cross-sublane (XLU) reduce per chunk.
    """
    k = pl.program_id(2)

    def chunk_stats(nrows):
        n_full = (nrows // slab) * slab
        if n_full > 0:
            first = x_ref[0, 0:slab, :].astype(jnp.float32)
            acc_s, acc_m = first, first
            for lo in range(slab, n_full, slab):          # VPU-only accumulation
                xs = x_ref[0, lo:lo + slab, :].astype(jnp.float32)
                acc_s = acc_s + xs
                acc_m = jnp.maximum(acc_m, xs)
            s = jnp.sum(acc_s, axis=0, keepdims=True)     # one XLU reduce per chunk
            m = jnp.max(acc_m, axis=0, keepdims=True)
            if n_full < nrows:                            # static partial slab
                xs = x_ref[0, n_full:nrows, :].astype(jnp.float32)
                s = s + jnp.sum(xs, axis=0, keepdims=True)
                m = jnp.maximum(m, jnp.max(xs, axis=0, keepdims=True))
        else:
            xs = x_ref[0, 0:nrows, :].astype(jnp.float32)
            s = jnp.sum(xs, axis=0, keepdims=True)
            m = jnp.max(xs, axis=0, keepdims=True)
        return s, m

    def combine(s, m):
        @pl.when(k == 0)
        def _():
            f_ref[0, 0:1, :] = s
            f_ref[0, 1:2, :] = m

        @pl.when(k > 0)
        def _():
            f_ref[0, 0:1, :] = f_ref[0, 0:1, :] + s
            f_ref[0, 1:2, :] = jnp.maximum(f_ref[0, 1:2, :], m)

    if tail == 0:
        s, m = chunk_stats(chunk)
        combine(s, m)
    else:
        # Static tail handling: only the last chunk processes `tail` rows; no
        # iota/where masking and no reads of the undefined edge-block rows.
        last = pl.num_programs(2) - 1

        @pl.when(k != last)
        def _():
            s, m = chunk_stats(chunk)
            combine(s, m)

        @pl.when(k == last)
        def _():
            s, m = chunk_stats(tail)
            combine(s, m)


def _conv_kernel(f_ref, m_ref, o_ref, pad_ref, *, H, W):
    """7x7 'same' conv (2 -> 1 ch, no bias) as banded MXU matmuls + sigmoid."""
    # Row zero-padding lives in a small VMEM scratch (no XLA pad / extra HBM copy).
    pad_ref[:, 0:PAD, :] = jnp.zeros((2, PAD, W), jnp.float32)
    pad_ref[:, PAD + H:, :] = jnp.zeros((2, PAD, W), jnp.float32)
    pad_ref[:, PAD:PAD + H, :] = f_ref[0]

    acc = jnp.zeros((H, W), jnp.float32)
    # TODO(synk): for very large W, band-tile the dense (W, W) weight matrix
    # (it scales as W^2) and/or stack the 14 bands into one wide contraction
    # to better fill the 256-wide MXU.
    for c in range(2):
        for dy in range(K):
            band = pad_ref[c, dy:dy + H, :]               # (H, W) sublane-offset slice
            acc = acc + jnp.dot(band, m_ref[c, dy],
                                preferred_element_type=jnp.float32)
    o_ref[0, 0] = jax.nn.sigmoid(acc).astype(o_ref.dtype)


def _banded_weights(weight, W, C):
    """(1,2,K,K) conv weight -> (2,K,W,W) with M[c,dy,j,xo] = w[c,dy, j-xo+PAD].

    The 1/C mean scaling is folded into the avg-channel (c == 0) taps so the
    reduction kernel can emit a raw channel sum instead of the mean.
    """
    w = weight.reshape(2, K, K).astype(jnp.float32)
    w = w.at[0].multiply(jnp.float32(1.0 / C))
    j = jnp.arange(W)[:, None]          # input column (unpadded coords)
    xo = jnp.arange(W)[None, :]         # output column
    dx = j - xo + PAD
    valid = (dx >= 0) & (dx < K)
    dxc = jnp.clip(dx, 0, K - 1)
    return jnp.where(valid[None, None], w[:, :, dxc], 0.0)


@jax.jit
def spatial_attention(x, weight):
    """x: (B, C, H, W);  weight: (1, 2, K, K) conv weight (no bias)."""
    B, C, H, W = x.shape
    HW = H * W
    itemsize = jnp.dtype(x.dtype).itemsize
    chunk, tile_hw = _pick_tiles(C, HW, itemsize)
    n_chunks = pl.cdiv(C, chunk)
    n_hw = pl.cdiv(HW, tile_hw)
    tail = C % chunk
    slab = 8 * max(1, 4 // itemsize)    # dtype-aware sublane slab (8 f32 / 16 bf16 / 32 i8)

    # ---- stage 1: lane-dense channel sum / max -> (B, 2, H*W) f32 ----
    x_flat = x.reshape(B, C, HW)
    feat = pl.pallas_call(
        functools.partial(_reduce_kernel, chunk=chunk, tail=tail, slab=slab),
        out_shape=jax.ShapeDtypeStruct((B, 2, HW), jnp.float32),
        grid_spec=pltpu.PrefetchScalarGridSpec(
            num_scalar_prefetch=0,
            grid=(B, n_hw, n_chunks),
            in_specs=[pl.BlockSpec((1, chunk, tile_hw),
                                   lambda b, t, k: (b, k, t))],
            out_specs=pl.BlockSpec((1, 2, tile_hw),
                                   lambda b, t, k: (b, 0, t)),
        ),
        compiler_params=pltpu.CompilerParams(
            dimension_semantics=("parallel", "parallel", "arbitrary"),
            vmem_limit_bytes=_VMEM_LIMIT,
        ),
    )(x_flat)

    # ---- stage 2: 7x7 conv via banded MXU matmuls + sigmoid ----
    mmat = _banded_weights(weight, W, C)                  # (2, K, W, W), 1/C folded in
    Hp = H + 2 * PAD
    out = pl.pallas_call(
        functools.partial(_conv_kernel, H=H, W=W),
        out_shape=jax.ShapeDtypeStruct((B, 1, H, W), x.dtype),
        grid_spec=pltpu.PrefetchScalarGridSpec(
            num_scalar_prefetch=0,
            grid=(B,),
            in_specs=[
                pl.BlockSpec((1, 2, H, W), lambda b: (b, 0, 0, 0)),
                pl.BlockSpec((2, K, W, W), lambda b: (0, 0, 0, 0)),
            ],
            out_specs=pl.BlockSpec((1, 1, H, W), lambda b: (b, 0, 0, 0)),
            scratch_shapes=[pltpu.VMEM((2, Hp, W), jnp.float32)],
        ),
        compiler_params=pltpu.CompilerParams(
            dimension_semantics=("parallel",),
            vmem_limit_bytes=_VMEM_LIMIT,
        ),
    )(feat.reshape(B, 2, H, W), mmat)
    return out


if __name__ == "__main__":
    key = jax.random.PRNGKey(0)
    kx, kw = jax.random.split(key)

    B, C, H, W = 2, 4, 16, 16
    x = jax.random.normal(kx, (B, C, H, W), dtype=jnp.float32)

    # Conv2d(2, 1, 7, padding=3, bias=False) weight, deterministic init.
    fan_in = 2 * K * K
    bound = (1.0 / fan_in) ** 0.5
    weight = jax.random.uniform(kw, (1, 2, K, K), jnp.float32, -bound, bound)

    out = spatial_attention(x, weight)
    out = jax.block_until_ready(out)

    # Pure-JAX reference.
    avg = jnp.mean(x, axis=1, keepdims=True)
    mx = jnp.max(x, axis=1, keepdims=True)
    feat = jnp.concatenate([avg, mx], axis=1)
    conv = lax.conv_general_dilated(
        feat, weight, window_strides=(1, 1),
        padding=[(PAD, PAD), (PAD, PAD)],
        dimension_numbers=("NCHW", "OIHW", "NCHW"),
        precision=lax.Precision.HIGHEST,
    )
    ref = jax.nn.sigmoid(conv)

    assert out.shape == (B, 1, H, W), out.shape
    err = float(jnp.max(jnp.abs(out - ref)))
    assert err < 2e-3, err
    print("KERNEL_OK")
</pallas_src>

<mosaic_0001>
module attributes {stable_mosaic.version = 11 : i64} {
  func.func @_reduce_kernel(%arg0: i32, %arg1: i32, %arg2: i32, %arg3: memref<1x4x256xf32, #tpu.memory_space<vmem>>, %arg4: memref<1x2x256xf32, #tpu.memory_space<vmem>>) attributes {dimension_semantics = [#tpu.dimension_semantics<parallel>, #tpu.dimension_semantics<parallel>, #tpu.dimension_semantics<arbitrary>], iteration_bounds = array<i64: 2, 1, 1>, scalar_prefetch = 0 : i64, scratch_operands = 0 : i64, tpu.core_type = #tpu.core_type<tc>, window_params = [{transform_indices = @transform_0, window_bounds = array<i64: 1, 4, 256>}, {transform_indices = @transform_1, window_bounds = array<i64: 1, 2, 256>}]} {
    %c0 = arith.constant 0 : index
    %c0_0 = arith.constant 0 : index
    %c0_1 = arith.constant 0 : index
    %0 = vector.load %arg3[%c0, %c0_0, %c0_1] : memref<1x4x256xf32, #tpu.memory_space<vmem>>, vector<1x4x256xf32>
    %1 = vector.shape_cast %0 : vector<1x4x256xf32> to vector<4x256xf32>
    %cst = arith.constant dense<0.000000e+00> : vector<256xf32>
    %2 = vector.multi_reduction <add>, %1, %cst [0] : vector<4x256xf32> to vector<256xf32>
    %3 = vector.shape_cast %2 : vector<256xf32> to vector<1x256xf32>
    %cst_2 = arith.constant dense<0xFF800000> : vector<256xf32>
    %4 = vector.multi_reduction <maximumf>, %1, %cst_2 [0] : vector<4x256xf32> to vector<256xf32>
    %5 = vector.shape_cast %4 : vector<256xf32> to vector<1x256xf32>
    %c0_i32 = arith.constant 0 : i32
    %6 = arith.cmpi eq, %arg2, %c0_i32 : i32
    %7 = arith.extui %6 : i1 to i32
    %c0_i32_3 = arith.constant 0 : i32
    %8 = arith.cmpi ne, %7, %c0_i32_3 : i32
    scf.if %8 {
      %c0_6 = arith.constant 0 : index
      %c0_7 = arith.constant 0 : index
      %c0_8 = arith.constant 0 : index
      %12 = vector.load %arg4[%c0_6, %c0_7, %c0_8] : memref<1x2x256xf32, #tpu.memory_space<vmem>>, vector<1x1x256xf32>
      %13 = vector.shape_cast %12 : vector<1x1x256xf32> to vector<1x256xf32>
      %14 = vector.shape_cast %3 : vector<1x256xf32> to vector<1x1x256xf32>
      tpu.vector_store %arg4[%c0_6, %c0_7, %c0_8], %14 {strides = array<i32>} : memref<1x2x256xf32, #tpu.memory_space<vmem>>, vector<1x1x256xf32>,
      %c0_9 = arith.constant 0 : index
      %c1 = arith.constant 1 : index
      %c0_10 = arith.constant 0 : index
      %15 = vector.load %arg4[%c0_9, %c1, %c0_10] : memref<1x2x256xf32, #tpu.memory_space<vmem>>, vector<1x1x256xf32>
      %16 = vector.shape_cast %15 : vector<1x1x256xf32> to vector<1x256xf32>
      %17 = vector.shape_cast %5 : vector<1x256xf32> to vector<1x1x256xf32>
      tpu.vector_store %arg4[%c0_9, %c1, %c0_10], %17 {strides = array<i32>} : memref<1x2x256xf32, #tpu.memory_space<vmem>>, vector<1x1x256xf32>,
    } else {
    }
    %c0_i32_4 = arith.constant 0 : i32
    %9 = arith.cmpi sgt, %arg2, %c0_i32_4 : i32
    %10 = arith.extui %9 : i1 to i32
    %c0_i32_5 = arith.constant 0 : i32
    %11 = arith.cmpi ne, %10, %c0_i32_5 : i32
    scf.if %11 {
      %c0_6 = arith.constant 0 : index
      %c0_7 = arith.constant 0 : index
      %c0_8 = arith.constant 0 : index
      %12 = vector.load %arg4[%c0_6, %c0_7, %c0_8] : memref<1x2x256xf32, #tpu.memory_space<vmem>>, vector<1x1x256xf32>
      %13 = vector.shape_cast %12 : vector<1x1x256xf32> to vector<1x256xf32>
      %14 = arith.addf %13, %3 : vector<1x256xf32>
      %c0_9 = arith.constant 0 : index
      %c0_10 = arith.constant 0 : index
      %c0_11 = arith.constant 0 : index
      %15 = vector.load %arg4[%c0_9, %c0_10, %c0_11] : memref<1x2x256xf32, #tpu.memory_space<vmem>>, vector<1x1x256xf32>
      %16 = vector.shape_cast %15 : vector<1x1x256xf32> to vector<1x256xf32>
      %17 = vector.shape_cast %14 : vector<1x256xf32> to vector<1x1x256xf32>
      tpu.vector_store %arg4[%c0_9, %c0_10, %c0_11], %17 {strides = array<i32>} : memref<1x2x256xf32, #tpu.memory_space<vmem>>, vector<1x1x256xf32>,
      %c0_12 = arith.constant 0 : index
      %c1 = arith.constant 1 : index
      %c0_13 = arith.constant 0 : index
      %18 = vector.load %arg4[%c0_12, %c1, %c0_13] : memref<1x2x256xf32, #tpu.memory_space<vmem>>, vector<1x1x256xf32>
      %19 = vector.shape_cast %18 : vector<1x1x256xf32> to vector<1x256xf32>
      %20 = arith.maximumf %19, %5 : vector<1x256xf32>
      %c0_14 = arith.constant 0 : index
      %c1_15 = arith.constant 1 : index
      %c0_16 = arith.constant 0 : index
      %21 = vector.load %arg4[%c0_14, %c1_15, %c0_16] : memref<1x2x256xf32, #tpu.memory_space<vmem>>, vector<1x1x256xf32>
      %22 = vector.shape_cast %21 : vector<1x1x256xf32> to vector<1x256xf32>
      %23 = vector.shape_cast %20 : vector<1x256xf32> to vector<1x1x256xf32>
      tpu.vector_store %arg4[%c0_14, %c1_15, %c0_16], %23 {strides = array<i32>} : memref<1x2x256xf32, #tpu.memory_space<vmem>>, vector<1x1x256xf32>,
    } else {
    }
    return
  }
  func.func @transform_0(%arg0: i32, %arg1: i32, %arg2: i32) -> (i32, i32, i32) {
    %c0_i32 = arith.constant 0 : i32
    return %arg0, %arg2, %arg1 : i32, i32, i32
  }
  func.func @transform_1(%arg0: i32, %arg1: i32, %arg2: i32) -> (i32, i32, i32) {
    %c0_i32 = arith.constant 0 : i32
    %c0_i32_0 = arith.constant 0 : i32
    return %arg0, %c0_i32, %arg1 : i32, i32, i32
  }
}

module attributes {stable_mosaic.version = 11 : i64} {
  func.func @_conv_kernel(%arg0: i32, %arg1: memref<1x2x16x16xf32, #tpu.memory_space<vmem>>, %arg2: memref<2x7x16x16xf32, #tpu.memory_space<vmem>>, %arg3: memref<1x1x16x16xf32, #tpu.memory_space<vmem>>, %arg4: memref<2x22x16xf32, #tpu.memory_space<vmem>>) attributes {dimension_semantics = [#tpu.dimension_semantics<parallel>], iteration_bounds = array<i64: 2>, scalar_prefetch = 0 : i64, scratch_operands = 1 : i64, tpu.core_type = #tpu.core_type<tc>, window_params = [{transform_indices = @transform_0, window_bounds = array<i64: 1, 2, 16, 16>}, {pipeline_mode = #tpu.pipeline_mode<synchronous>, transform_indices = @transform_1, window_bounds = array<i64: 2, 7, 16, 16>}, {transform_indices = @transform_2, window_bounds = array<i64: 1, 1, 16, 16>}]} {
    %cst = arith.constant 0.000000e+00 : f32
    %0 = vector.broadcast %cst : f32 to vector<2x3x16xf32>
    %c0 = arith.constant 0 : index
    %c0_0 = arith.constant 0 : index
    %c0_1 = arith.constant 0 : index
    %1 = vector.load %arg4[%c0, %c0_0, %c0_1] : memref<2x22x16xf32, #tpu.memory_space<vmem>>, vector<2x3x16xf32>
    tpu.vector_store %arg4[%c0, %c0_0, %c0_1], %0 {strides = array<i32>} : memref<2x22x16xf32, #tpu.memory_space<vmem>>, vector<2x3x16xf32>,
    %cst_2 = arith.constant 0.000000e+00 : f32
    %2 = vector.broadcast %cst_2 : f32 to vector<2x3x16xf32>
    %c0_3 = arith.constant 0 : index
    %c19 = arith.constant 19 : index
    %c0_4 = arith.constant 0 : index
    %3 = vector.load %arg4[%c0_3, %c19, %c0_4] : memref<2x22x16xf32, #tpu.memory_space<vmem>>, vector<2x3x16xf32>
    tpu.vector_store %arg4[%c0_3, %c19, %c0_4], %2 {strides = array<i32>} : memref<2x22x16xf32, #tpu.memory_space<vmem>>, vector<2x3x16xf32>,
    %c0_5 = arith.constant 0 : index
    %c0_6 = arith.constant 0 : index
    %c0_7 = arith.constant 0 : index
    %c0_8 = arith.constant 0 : index
    %4 = vector.load %arg1[%c0_5, %c0_6, %c0_7, %c0_8] : memref<1x2x16x16xf32, #tpu.memory_space<vmem>>, vector<1x2x16x16xf32>
    %5 = vector.shape_cast %4 : vector<1x2x16x16xf32> to vector<2x16x16xf32>
    %c0_9 = arith.constant 0 : index
    %c3 = arith.constant 3 : index
    %c0_10 = arith.constant 0 : index
    %6 = vector.load %arg4[%c0_9, %c3, %c0_10] : memref<2x22x16xf32, #tpu.memory_space<vmem>>, vector<2x16x16xf32>
    tpu.vector_store %arg4[%c0_9, %c3, %c0_10], %5 {strides = array<i32>} : memref<2x22x16xf32, #tpu.memory_space<vmem>>, vector<2x16x16xf32>,
    %cst_11 = arith.constant 0.000000e+00 : f32
    %7 = vector.broadcast %cst_11 : f32 to vector<16x16xf32>
    %c0_12 = arith.constant 0 : index
    %c0_13 = arith.constant 0 : index
    %c0_14 = arith.constant 0 : index
    %8 = vector.load %arg4[%c0_12, %c0_13, %c0_14] : memref<2x22x16xf32, #tpu.memory_space<vmem>>, vector<1x16x16xf32>
    %9 = vector.shape_cast %8 : vector<1x16x16xf32> to vector<16x16xf32>
    %c0_15 = arith.constant 0 : index
    %c0_16 = arith.constant 0 : index
    %c0_17 = arith.constant 0 : index
    %c0_18 = arith.constant 0 : index
    %10 = vector.load %arg2[%c0_15, %c0_16, %c0_17, %c0_18] : memref<2x7x16x16xf32, #tpu.memory_space<vmem>>, vector<1x1x16x16xf32>
    %11 = vector.shape_cast %10 : vector<1x1x16x16xf32> to vector<16x16xf32>
    %cst_19 = arith.constant dense<0.000000e+00> : vector<16x16xf32>
    %12 = tpu.matmul %9, %11, %cst_19 {dimension_numbers = #tpu.dot_dimension_numbers<[1], [0], [0], [1], [0, 0, 1, 1], [], []>} : vector<16x16xf32>, vector<16x16xf32>, vector<16x16xf32> -> vector<16x16xf32>
    %13 = arith.addf %7, %12 : vector<16x16xf32>
    %c0_20 = arith.constant 0 : index
    %c1 = arith.constant 1 : index
    %c0_21 = arith.constant 0 : index
    %14 = vector.load %arg4[%c0_20, %c1, %c0_21] : memref<2x22x16xf32, #tpu.memory_space<vmem>>, vector<1x16x16xf32>
    %15 = vector.shape_cast %14 : vector<1x16x16xf32> to vector<16x16xf32>
    %c0_22 = arith.constant 0 : index
    %c1_23 = arith.constant 1 : index
    %c0_24 = arith.constant 0 : index
    %c0_25 = arith.constant 0 : index
    %16 = vector.load %arg2[%c0_22, %c1_23, %c0_24, %c0_25] : memref<2x7x16x16xf32, #tpu.memory_space<vmem>>, vector<1x1x16x16xf32>
    %17 = vector.shape_cast %16 : vector<1x1x16x16xf32> to vector<16x16xf32>
    %cst_26 = arith.constant dense<0.000000e+00> : vector<16x16xf32>
    %18 = tpu.matmul %15, %17, %cst_26 {dimension_numbers = #tpu.dot_dimension_numbers<[1], [0], [0], [1], [0, 0, 1, 1], [], []>} : vector<16x16xf32>, vector<16x16xf32>, vector<16x16xf32> -> vector<16x16xf32>
    %19 = arith.addf %13, %18 : vector<16x16xf32>
    %c0_27 = arith.constant 0 : index
    %c2 = arith.constant 2 : index
    %c0_28 = arith.constant 0 : index
    %20 = vector.load %arg4[%c0_27, %c2, %c0_28] : memref<2x22x16xf32, #tpu.memory_space<vmem>>, vector<1x16x16xf32>
    %21 = vector.shape_cast %20 : vector<1x16x16xf32> to vector<16x16xf32>
    %c0_29 = arith.constant 0 : index
    %c2_30 = arith.constant 2 : index
    %c0_31 = arith.constant 0 : index
    %c0_32 = arith.constant 0 : index
    %22 = vector.load %arg2[%c0_29, %c2_30, %c0_31, %c0_32] : memref<2x7x16x16xf32, #tpu.memory_space<vmem>>, vector<1x1x16x16xf32>
    %23 = vector.shape_cast %22 : vector<1x1x16x16xf32> to vector<16x16xf32>
    %cst_33 = arith.constant dense<0.000000e+00> : vector<16x16xf32>
    %24 = tpu.matmul %21, %23, %cst_33 {dimension_numbers = #tpu.dot_dimension_numbers<[1], [0], [0], [1], [0, 0, 1, 1], [], []>} : vector<16x16xf32>, vector<16x16xf32>, vector<16x16xf32> -> vector<16x16xf32>
    %25 = arith.addf %19, %24 : vector<16x16xf32>
    %c0_34 = arith.constant 0 : index
    %c3_35 = arith.constant 3 : index
    %c0_36 = arith.constant 0 : index
    %26 = vector.load %arg4[%c0_34, %c3_35, %c0_36] : memref<2x22x16xf32, #tpu.memory_space<vmem>>, vector<1x16x16xf32>
    %27 = vector.shape_cast %26 : vector<1x16x16xf32> to vector<16x16xf32>
    %c0_37 = arith.constant 0 : index
    %c3_38 = arith.constant 3 : index
    %c0_39 = arith.constant 0 : index
    %c0_40 = arith.constant 0 : index
    %28 = vector.load %arg2[%c0_37, %c3_38, %c0_39, %c0_40] : memref<2x7x16x16xf32, #tpu.memory_space<vmem>>, vector<1x1x16x16xf32>
    %29 = vector.shape_cast %28 : vector<1x1x16x16xf32> to vector<16x16xf32>
    %cst_41 = arith.constant dense<0.000000e+00> : vector<16x16xf32>
    %30 = tpu.matmul %27, %29, %cst_41 {dimension_numbers = #tpu.dot_dimension_numbers<[1], [0], [0], [1], [0, 0, 1, 1], [], []>} : vector<16x16xf32>, vector<16x16xf32>, vector<16x16xf32> -> vector<16x16xf32>
    %31 = arith.addf %25, %30 : vector<16x16xf32>
    %c0_42 = arith.constant 0 : index
    %c4 = arith.constant 4 : index
    %c0_43 = arith.constant 0 : index
    %32 = vector.load %arg4[%c0_42, %c4, %c0_43] : memref<2x22x16xf32, #tpu.memory_space<vmem>>, vector<1x16x16xf32>
    %33 = vector.shape_cast %32 : vector<1x16x16xf32> to vector<16x16xf32>
    %c0_44 = arith.constant 0 : index
    %c4_45 = arith.constant 4 : index
    %c0_46 = arith.constant 0 : index
    %c0_47 = arith.constant 0 : index
    %34 = vector.load %arg2[%c0_44, %c4_45, %c0_46, %c0_47] : memref<2x7x16x16xf32, #tpu.memory_space<vmem>>, vector<1x1x16x16xf32>
    %35 = vector.shape_cast %34 : vector<1x1x16x16xf32> to vector<16x16xf32>
    %cst_48 = arith.constant dense<0.000000e+00> : vector<16x16xf32>
    %36 = tpu.matmul %33, %35, %cst_48 {dimension_numbers = #tpu.dot_dimension_numbers<[1], [0], [0], [1], [0, 0, 1, 1], [], []>} : vector<16x16xf32>, vector<16x16xf32>, vector<16x16xf32> -> vector<16x16xf32>
    %37 = arith.addf %31, %36 : vector<16x16xf32>
    %c0_49 = arith.constant 0 : index
    %c5 = arith.constant 5 : index
    %c0_50 = arith.constant 0 : index
    %38 = vector.load %arg4[%c0_49, %c5, %c0_50] : memref<2x22x16xf32, #tpu.memory_space<vmem>>, vector<1x16x16xf32>
    %39 = vector.shape_cast %38 : vector<1x16x16xf32> to vector<16x16xf32>
    %c0_51 = arith.constant 0 : index
    %c5_52 = arith.constant 5 : index
    %c0_53 = arith.constant 0 : index
    %c0_54 = arith.constant 0 : index
    %40 = vector.load %arg2[%c0_51, %c5_52, %c0_53, %c0_54] : memref<2x7x16x16xf32, #tpu.memory_space<vmem>>, vector<1x1x16x16xf32>
    %41 = vector.shape_cast %40 : vector<1x1x16x16xf32> to vector<16x16xf32>
    %cst_55 = arith.constant dense<0.000000e+00> : vector<16x16xf32>
    %42 = tpu.matmul %39, %41, %cst_55 {dimension_numbers = #tpu.dot_dimension_numbers<[1], [0], [0], [1], [0, 0, 1, 1], [], []>} : vector<16x16xf32>, vector<16x16xf32>, vector<16x16xf32> -> vector<16x16xf32>
    %43 = arith.addf %37, %42 : vector<16x16xf32>
    %c0_56 = arith.constant 0 : index
    %c6 = arith.constant 6 : index
    %c0_57 = arith.constant 0 : index
    %44 = vector.load %arg4[%c0_56, %c6, %c0_57] : memref<2x22x16xf32, #tpu.memory_space<vmem>>, vector<1x16x16xf32>
    %45 = vector.shape_cast %44 : vector<1x16x16xf32> to vector<16x16xf32>
    %c0_58 = arith.constant 0 : index
    %c6_59 = arith.constant 6 : index
    %c0_60 = arith.constant 0 : index
    %c0_61 = arith.constant 0 : index
    %46 = vector.load %arg2[%c0_58, %c6_59, %c0_60, %c0_61] : memref<2x7x16x16xf32, #tpu.memory_space<vmem>>, vector<1x1x16x16xf32>
    %47 = vector.shape_cast %46 : vector<1x1x16x16xf32> to vector<16x16xf32>
    %cst_62 = arith.constant dense<0.000000e+00> : vector<16x16xf32>
    %48 = tpu.matmul %45, %47, %cst_62 {dimension_numbers = #tpu.dot_dimension_numbers<[1], [0], [0], [1], [0, 0, 1, 1], [], []>} : vector<16x16xf32>, vector<16x16xf32>, vector<16x16xf32> -> vector<16x16xf32>
    %49 = arith.addf %43, %48 : vector<16x16xf32>
    %c1_63 = arith.constant 1 : index
    %c0_64 = arith.constant 0 : index
    %c0_65 = arith.constant 0 : index
    %50 = vector.load %arg4[%c1_63, %c0_64, %c0_65] : memref<2x22x16xf32, #tpu.memory_space<vmem>>, vector<1x16x16xf32>
    %51 = vector.shape_cast %50 : vector<1x16x16xf32> to vector<16x16xf32>
    %c1_66 = arith.constant 1 : index
    %c0_67 = arith.constant 0 : index
    %c0_68 = arith.constant 0 : index
    %c0_69 = arith.constant 0 : index
    %52 = vector.load %arg2[%c1_66, %c0_67, %c0_68, %c0_69] : memref<2x7x16x16xf32, #tpu.memory_space<vmem>>, vector<1x1x16x16xf32>
    %53 = vector.shape_cast %52 : vector<1x1x16x16xf32> to vector<16x16xf32>
    %cst_70 = arith.constant dense<0.000000e+00> : vector<16x16xf32>
    %54 = tpu.matmul %51, %53, %cst_70 {dimension_numbers = #tpu.dot_dimension_numbers<[1], [0], [0], [1], [0, 0, 1, 1], [], []>} : vector<16x16xf32>, vector<16x16xf32>, vector<16x16xf32> -> vector<16x16xf32>
    %55 = arith.addf %49, %54 : vector<16x16xf32>
    %c1_71 = arith.constant 1 : index
    %c1_72 = arith.constant 1 : index
    %c0_73 = arith.constant 0 : index
    %56 = vector.load %arg4[%c1_71, %c1_72, %c0_73] : memref<2x22x16xf32, #tpu.memory_space<vmem>>, vector<1x16x16xf32>
    %57 = vector.shape_cast %56 : vector<1x16x16xf32> to vector<16x16xf32>
    %c1_74 = arith.constant 1 : index
    %c1_75 = arith.constant 1 : index
    %c0_76 = arith.constant 0 : index
    %c0_77 = arith.constant 0 : index
    %58 = vector.load %arg2[%c1_74, %c1_75, %c0_76, %c0_77] : memref<2x7x16x16xf32, #tpu.memory_space<vmem>>, vector<1x1x16x16xf32>
    %59 = vector.shape_cast %58 : vector<1x1x16x16xf32> to vector<16x16xf32>
    %cst_78 = arith.constant dense<0.000000e+00> : vector<16x16xf32>
    %60 = tpu.matmul %57, %59, %cst_78 {dimension_numbers = #tpu.dot_dimension_numbers<[1], [0], [0], [1], [0, 0, 1, 1], [], []>} : vector<16x16xf32>, vector<16x16xf32>, vector<16x16xf32> -> vector<16x16xf32>
    %61 = arith.addf %55, %60 : vector<16x16xf32>
    %c1_79 = arith.constant 1 : index
    %c2_80 = arith.constant 2 : index
    %c0_81 = arith.constant 0 : index
    %62 = vector.load %arg4[%c1_79, %c2_80, %c0_81] : memref<2x22x16xf32, #tpu.memory_space<vmem>>, vector<1x16x16xf32>
    %63 = vector.shape_cast %62 : vector<1x16x16xf32> to vector<16x16xf32>
    %c1_82 = arith.constant 1 : index
    %c2_83 = arith.constant 2 : index
    %c0_84 = arith.constant 0 : index
    %c0_85 = arith.constant 0 : index
    %64 = vector.load %arg2[%c1_82, %c2_83, %c0_84, %c0_85] : memref<2x7x16x16xf32, #tpu.memory_space<vmem>>, vector<1x1x16x16xf32>
    %65 = vector.shape_cast %64 : vector<1x1x16x16xf32> to vector<16x16xf32>
    %cst_86 = arith.constant dense<0.000000e+00> : vector<16x16xf32>
    %66 = tpu.matmul %63, %65, %cst_86 {dimension_numbers = #tpu.dot_dimension_numbers<[1], [0], [0], [1], [0, 0, 1, 1], [], []>} : vector<16x16xf32>, vector<16x16xf32>, vector<16x16xf32> -> vector<16x16xf32>
    %67 = arith.addf %61, %66 : vector<16x16xf32>
    %c1_87 = arith.constant 1 : index
    %c3_88 = arith.constant 3 : index
    %c0_89 = arith.constant 0 : index
    %68 = vector.load %arg4[%c1_87, %c3_88, %c0_89] : memref<2x22x16xf32, #tpu.memory_space<vmem>>, vector<1x16x16xf32>
    %69 = vector.shape_cast %68 : vector<1x16x16xf32> to vector<16x16xf32>
    %c1_90 = arith.constant 1 : index
    %c3_91 = arith.constant 3 : index
    %c0_92 = arith.constant 0 : index
    %c0_93 = arith.constant 0 : index
    %70 = vector.load %arg2[%c1_90, %c3_91, %c0_92, %c0_93] : memref<2x7x16x16xf32, #tpu.memory_space<vmem>>, vector<1x1x16x16xf32>
    %71 = vector.shape_cast %70 : vector<1x1x16x16xf32> to vector<16x16xf32>
    %cst_94 = arith.constant dense<0.000000e+00> : vector<16x16xf32>
    %72 = tpu.matmul %69, %71, %cst_94 {dimension_numbers = #tpu.dot_dimension_numbers<[1], [0], [0], [1], [0, 0, 1, 1], [], []>} : vector<16x16xf32>, vector<16x16xf32>, vector<16x16xf32> -> vector<16x16xf32>
    %73 = arith.addf %67, %72 : vector<16x16xf32>
    %c1_95 = arith.constant 1 : index
    %c4_96 = arith.constant 4 : index
    %c0_97 = arith.constant 0 : index
    %74 = vector.load %arg4[%c1_95, %c4_96, %c0_97] : memref<2x22x16xf32, #tpu.memory_space<vmem>>, vector<1x16x16xf32>
    %75 = vector.shape_cast %74 : vector<1x16x16xf32> to vector<16x16xf32>
    %c1_98 = arith.constant 1 : index
    %c4_99 = arith.constant 4 : index
    %c0_100 = arith.constant 0 : index
    %c0_101 = arith.constant 0 : index
    %76 = vector.load %arg2[%c1_98, %c4_99, %c0_100, %c0_101] : memref<2x7x16x16xf32, #tpu.memory_space<vmem>>, vector<1x1x16x16xf32>
    %77 = vector.shape_cast %76 : vector<1x1x16x16xf32> to vector<16x16xf32>
    %cst_102 = arith.constant dense<0.000000e+00> : vector<16x16xf32>
    %78 = tpu.matmul %75, %77, %cst_102 {dimension_numbers = #tpu.dot_dimension_numbers<[1], [0], [0], [1], [0, 0, 1, 1], [], []>} : vector<16x16xf32>, vector<16x16xf32>, vector<16x16xf32> -> vector<16x16xf32>
    %79 = arith.addf %73, %78 : vector<16x16xf32>
    %c1_103 = arith.constant 1 : index
    %c5_104 = arith.constant 5 : index
    %c0_105 = arith.constant 0 : index
    %80 = vector.load %arg4[%c1_103, %c5_104, %c0_105] : memref<2x22x16xf32, #tpu.memory_space<vmem>>, vector<1x16x16xf32>
    %81 = vector.shape_cast %80 : vector<1x16x16xf32> to vector<16x16xf32>
    %c1_106 = arith.constant 1 : index
    %c5_107 = arith.constant 5 : index
    %c0_108 = arith.constant 0 : index
    %c0_109 = arith.constant 0 : index
    %82 = vector.load %arg2[%c1_106, %c5_107, %c0_108, %c0_109] : memref<2x7x16x16xf32, #tpu.memory_space<vmem>>, vector<1x1x16x16xf32>
    %83 = vector.shape_cast %82 : vector<1x1x16x16xf32> to vector<16x16xf32>
    %cst_110 = arith.constant dense<0.000000e+00> : vector<16x16xf32>
    %84 = tpu.matmul %81, %83, %cst_110 {dimension_numbers = #tpu.dot_dimension_numbers<[1], [0], [0], [1], [0, 0, 1, 1], [], []>} : vector<16x16xf32>, vector<16x16xf32>, vector<16x16xf32> -> vector<16x16xf32>
    %85 = arith.addf %79, %84 : vector<16x16xf32>
    %c1_111 = arith.constant 1 : index
    %c6_112 = arith.constant 6 : index
    %c0_113 = arith.constant 0 : index
    %86 = vector.load %arg4[%c1_111, %c6_112, %c0_113] : memref<2x22x16xf32, #tpu.memory_space<vmem>>, vector<1x16x16xf32>
    %87 = vector.shape_cast %86 : vector<1x16x16xf32> to vector<16x16xf32>
    %c1_114 = arith.constant 1 : index
    %c6_115 = arith.constant 6 : index
    %c0_116 = arith.constant 0 : index
    %c0_117 = arith.constant 0 : index
    %88 = vector.load %arg2[%c1_114, %c6_115, %c0_116, %c0_117] : memref<2x7x16x16xf32, #tpu.memory_space<vmem>>, vector<1x1x16x16xf32>
    %89 = vector.shape_cast %88 : vector<1x1x16x16xf32> to vector<16x16xf32>
    %cst_118 = arith.constant dense<0.000000e+00> : vector<16x16xf32>
    %90 = tpu.matmul %87, %89, %cst_118 {dimension_numbers = #tpu.dot_dimension_numbers<[1], [0], [0], [1], [0, 0, 1, 1], [], []>} : vector<16x16xf32>, vector<16x16xf32>, vector<16x16xf32> -> vector<16x16xf32>
    %91 = arith.addf %85, %90 : vector<16x16xf32>
    %92 = arith.negf %91 : vector<16x16xf32>
    %93 = math.exp %92 : vector<16x16xf32>
    %cst_119 = arith.constant 1.000000e+00 : f32
    %94 = vector.broadcast %cst_119 : f32 to vector<16x16xf32>
    %95 = arith.addf %94, %93 : vector<16x16xf32>
    %96 = arith.divf %94, %95 : vector<16x16xf32>
    %c0_120 = arith.constant 0 : index
    %c0_121 = arith.constant 0 : index
    %c0_122 = arith.constant 0 : index
    %c0_123 = arith.constant 0 : index
    %97 = vector.load %arg3[%c0_120, %c0_121, %c0_122, %c0_123] : memref<1x1x16x16xf32, #tpu.memory_space<vmem>>, vector<1x1x16x16xf32>
    %98 = vector.shape_cast %97 : vector<1x1x16x16xf32> to vector<16x16xf32>
    %99 = vector.shape_cast %96 : vector<16x16xf32> to vector<1x1x16x16xf32>
    tpu.vector_store %arg3[%c0_120, %c0_121, %c0_122, %c0_123], %99 {strides = array<i32>} : memref<1x1x16x16xf32, #tpu.memory_space<vmem>>, vector<1x1x16x16xf32>,
    return
  }
  func.func @transform_0(%arg0: i32) -> (i32, i32, i32, i32) {
    %c0_i32 = arith.constant 0 : i32
    %c0_i32_0 = arith.constant 0 : i32
    %c0_i32_1 = arith.constant 0 : i32
    %c0_i32_2 = arith.constant 0 : i32
    return %arg0, %c0_i32, %c0_i32_0, %c0_i32_1 : i32, i32, i32, i32
  }
  func.func @transform_1(%arg0: i32) -> (i32, i32, i32, i32) {
    %c0_i32 = arith.constant 0 : i32
    %c0_i32_0 = arith.constant 0 : i32
    %c0_i32_1 = arith.constant 0 : i32
    %c0_i32_2 = arith.constant 0 : i32
    %c0_i32_3 = arith.constant 0 : i32
    return %c0_i32, %c0_i32_0, %c0_i32_1, %c0_i32_2 : i32, i32, i32, i32
  }
  func.func @transform_2(%arg0: i32) -> (i32, i32, i32, i32) {
    %c0_i32 = arith.constant 0 : i32
    %c0_i32_0 = arith.constant 0 : i32
    %c0_i32_1 = arith.constant 0 : i32
    %c0_i32_2 = arith.constant 0 : i32
    return %arg0, %c0_i32, %c0_i32_0, %c0_i32_1 : i32, i32, i32, i32
  }
}

</mosaic_0001>

<bundles_post_ra>
// kernel: spatial_attention.2
= control target key start
LH: loop header
LB: loop body
LE: loop exit
PB: predicated region body
PF: predicated region fallthrough
CT: control target
= control target key end

     0   :  { %s481_s6 = smov 0   ;;  %s483_s7 = smov 0   ;;  %s518_s0 = inlined_call_operand.vmem [shape: f32[2,4,256], index: 0, kind: input, shape index: {}]   ;;  %s519_s1 = inlined_call_operand.vmem [shape: f32[2,2,256], index: 1, kind: output, shape index: {}]  }
   0x1   :  { %s485_s8 = smov 0  }
   0x2 LB: > { %s30_s9 = sadd.s32 1, %s464_s7  ;;  %p408_p0 = scmp.ge.s32.totalorder %s468_s8, 1  ;;  %s468_s8 = sphi %s485_s8, %s11_s8   ;;  %s464_s7 = sphi %s483_s7, %s521_s7   ;;  %s460_s6 = sphi %s481_s6, %s520_s6  }
   0x3   : > { %p32_p1 = scmp.ge.s32.totalorder %s30_s9, 2  ;;  %p121_p2 = scmp.lt.s32.totalorder %s468_s8, 3 }
   0x5   : > { %s523_s9 = smov (%p32_p1, %s30_s9), 0  ;;  %p122_p3 = pnand %p408_p0, %p121_p2 }
   0x6   : > { %p154_p4 = scmp.lt.s32.totalorder (!%p122_p3), %s460_s6, 1 }
   0x7   : > { %125 = sbr.rel (%p122_p3) target bundleno = 38 (0x26), region = 24 }
   0xc   : > { %s525_s6 = smov (!%p154_p4, %s460_s6), 1  ;;  %vm181_vm0 = vcmask 1043456   ;;  %v470_v12 = vmov 1966171168   ;;  %v220_v14 = vlaneseq }
   0xd   : > { %s418_s10 = sshll.u32 %s525_s6, 3  ;;  %v218_v13 = vunpack.c.l.s4 %v470_v12  ;;  %s419_s14 = sshll.u32 %s525_s6, 2 }
   0xe   : > { %s165_s13 = scalar_lea.vmem %s518_s0, %s418_s10  ;;  %v221_v24 = vshrl.u32 %v220_v14, 7  ;;  %s175_s17 = scalar_lea.vmem %s519_s1, %s419_s14  ;;  %vm234_vm1 = vcmp.lt.s32.totalorder %v220_v14, 256 }
   0xf   : > { %v177_v0 = vld [vmem:[%s165_s13] sm:$0xff]  ;;  %v219_v23 = vunpack.c.0.s8 %v218_v13 }
  0x10   : > { %v179_v1 = vcombine.high %v177_v0, %v177_v0  ;;  %v182_v2 = vsel %vm181_vm0, %v177_v0, 0.0  ;;  %v196_v3 = vsel %vm181_vm0, %v177_v0, -inf }
  0x11   : > { %v183_v4 = vrot.slane %v182_v2, 4  ;;  %v197_v5 = vrot.slane %v196_v3, 4  ;;  %v222_v34 = vsub.s32 %v219_v23, %v221_v24 }
  0x12   : > { %v189_v6 = vsel %vm181_vm0, %v179_v1, 0.0  ;;  %v203_v7 = vsel %vm181_vm0, %v179_v1, -inf }
  0x13   : > { %v184_v8 = vadd.f32 %v183_v4, %v182_v2  ;;  %v190_v9 = vrot.slane %v189_v6, 4  ;;  %v198_v10 = vmax.f32 %v196_v3, %v197_v5  ;;  %v204_v11 = vrot.slane %v203_v7, 4 }
  0x15   : > { %v185_v15 = vrot.slane %v184_v8, 2  ;;  %v191_v16 = vadd.f32 %v190_v9, %v189_v6  ;;  %v199_v17 = vrot.slane %v198_v10, 2  ;;  %v205_v18 = vmax.f32 %v203_v7, %v204_v11 }
  0x17   : > { %v186_v19 = vadd.f32 %v185_v15, %v184_v8  ;;  %v192_v20 = vrot.slane %v191_v16, 2  ;;  %v200_v21 = vmax.f32 %v198_v10, %v199_v17  ;;  %v206_v22 = vrot.slane %v205_v18, 2 }
  0x19   : > { %v187_v25 = vrot.slane %v186_v19, 1  ;;  %v193_v26 = vadd.f32 %v192_v20, %v191_v16  ;;  %v201_v27 = vrot.slane %v200_v21, 1  ;;  %v207_v28 = vmax.f32 %v205_v18, %v206_v22 }
  0x1b   : > { %v188_v29 = vadd.f32 %v187_v25, %v186_v19  ;;  %v194_v30 = vrot.slane %v193_v26, 1  ;;  %v202_v31 = vmax.f32 %v200_v21, %v201_v27  ;;  %v208_v32 = vrot.slane %v207_v28, 1 }
  0x1d   : > { %v195_v33 = vadd.f32 %v194_v30, %v193_v26  ;;  %v209_v35 = vmax.f32 %v207_v28, %v208_v32 }
  0x1f   : > { %v216_v36 = vcombine.low %v188_v29, %v195_v33  ;;  %v239_v37 = vcombine.low %v202_v31, %v209_v35 }
  0x21   : > { %v223_v38 = vrot.slane %v216_v36, %v222_v34  ;;  %v246_v39 = vrot.slane %v239_v37, %v222_v34 }
  0x23   : > { %v230_v40 = vrot.slane %v223_v38, %v222_v34  ;;  %v253_v41 = vrot.slane %v246_v39, %v222_v34 }
  0x25   : > { %236 = vst.msk [vmem:[%s175_s17] ss:$2 sm:$0x3] %vm234_vm1, %v230_v40  ;;  %413 = vst.msk [vmem:[%s175_s17 + $0x1] ss:$2 sm:$0x3] %vm234_vm1, %v253_v41 }
  0x26 PF: > { %s11_s8 = sadd.s32 1, %s468_s8   ;;  %s520_s6 = smov %s464_s7 }
  0x27   : > { %p8_p5 = scmp.ge.s32.totalorder %s11_s8, 4   ;;  %s521_s7 = smov %s523_s9 }
  0x29   :  { %10 = sbr.rel (!%p8_p5) target bundleno = 2 (0x2), region = 64 }

// kernel: spatial_attention.3
= control target key start
LH: loop header
LB: loop body
LE: loop exit
PB: predicated region body
PF: predicated region fallthrough
CT: control target
= control target key end

     0   :  { %7 = vsyncpa [#allocation4], 0  ;;  %s2049_s0 = inlined_call_operand.vmem [shape: f32[2,2,16,16], index: 0, kind: input, shape index: {}]   ;;  %s2050_s1 = inlined_call_operand.vmem [shape: f32[2,7,16,16], index: 1, kind: input, shape index: {}]   ;;  %s2051_s2 = inlined_call_operand.hbm [shape: f32[2,1,16,16], index: 2, kind: output, shape index: {}]  }
   0x1   :  { %9 = vsyncpa [#allocation4 + $0x1], 0  ;;  %s1829_s9 = smov 0   ;;  %s1831_s10 = smov 0  }
   0x2   :  { %s1833_s11 = smov 0   ;;  %s1835_s12 = smov 0  }
   0x3 LB: > { %s1850_s13 = sadd.s32 4294967295, %s1808_s12   ;;  %s1474_s14 = sadd.s32 4294967294, %s1808_s12   ;;  %s1808_s12 = sphi %s1835_s12, %s2057_s12   ;;  %s1804_s11 = sphi %s1833_s11, %s2056_s11   ;;  %s1800_s10 = sphi %s1831_s10, %s2055_s10   ;;  %s1796_s9 = sphi %s1829_s9, %s2054_s9  }
   0x4   : > { %s1854_s15 = sadd.s32 1, %s1808_s12   ;;  %s69_s16 = sadd.s32 1, %s1804_s11 }
   0x5   : > { %s66_s17 = ssub.s32 %s1808_s12, %s1854_s15  ;;  %p79_p0 = scmp.ne.s32.totalorder %s1804_s11, %s1800_s10 }
   0x6   : > { %p67_p1 = scmp.eq.s32.totalorder %s66_s17, 0  ;;  %p80_p2 = scmp.eq.s32.totalorder %s1850_s13, 1 }
   0x7   : > { %p85_p3 = scmp.ne.s32.totalorder %s1800_s10, %s1796_s9  ;;  %p86_p4 = scmp.eq.s32.totalorder %s1474_s14, 1 }
   0x8   : > { %s1865_s18 = scalar_select %p67_p1, %s1804_s11, %s69_s16  }
   0x9   : > { %p1867_p5 = por %p80_p2, %p79_p0  ;;  %p1871_p6 = por %p86_p4, %p85_p3 }
   0xa   : > { %p1477_p7 = scmp.ge.s32.totalorder %s1808_s12, 1  ;;  %p115_p8 = scmp.lt.s32.totalorder %s1808_s12, 3 }
   0xc   : > { %p116_p9 = pnand %p1477_p7, %p115_p8 }
   0xd   : > { %p137_p10 = scmp.lt.s32.totalorder (!%p116_p9), %s1850_s13, 1  ;;  %s134_s25 = sand.u32 (!%p116_p9), 1, %s1800_s10  }
   0xe   : > { %119 = sbr.rel (%p116_p9) target bundleno = 313 (0x139), region = 28  ;;  %s1478_s26 = sshll.u32 (!%p116_p9), %s134_s25, 4 }
   0xf   : > { %s1543_s27 = sshll.u32 (!%p116_p9), %s1850_s13, 8  ;;  %s136_s28 = scalar_lea.vmem (!%p116_p9), [#allocation3], %s1478_s26 }
  0x10   : > { %s2003_s4 = scalar_lea.hbm (!%p116_p9), %s2051_s2, %s1543_s27  ;;  %s2009_s5 = scalar_lea.sflag (!%p116_p9), [#allocation4], %s134_s25 }
  0x13   : > { %v1482_v0 = vld [vmem:[%s2050_s1 + $0x18] sm:$0xff]  ;;  %v159_v1 = vld [vmem:[%s2050_s1 + $0x8] sm:$0xff]  ;;  %v1481_v2 = vld [vmem:[%s2050_s1 + $0x10] sm:$0xff]  ;;  %vm142_vm0 = vcmask 124928   ;;  %v1810_v4 = vmov 0.0   ;;  %s138_s29 = scalar_select %p137_p10, %s1850_s13, 1 }
  0x14   : > { %1600 = vmatprep.subr.mxu0 %v1482_v0  ;;  %1607 = vmatprep.subr.mxu1 %v159_v1  ;;  %v158_v3 = vld [vmem:[%s2050_s1] sm:$0xff]  ;;  %143 = vst.msk [vmem:[#allocation2] sm:$0x7] %vm142_vm0, %v1810_v4  ;;  %144 = vst.msk [vmem:[#allocation2 + $0x18] sm:$0x7] %vm142_vm0, %v1810_v4  ;;  %v1488_v5 = vld [vmem:[%s2050_s1 + $0x28] sm:$0xff] }
  0x15   : > { %145 = vst.msk [vmem:[#allocation2 + $0x13] sm:$0x7] %vm142_vm0, %v1810_v4  ;;  %146 = vst.msk [vmem:[#allocation2 + $0x2b] sm:$0x7] %vm142_vm0, %v1810_v4  ;;  %1601 = vmatpush3.msra.mxu0 %v1482_v0  ;;  %1608 = vmatpush3.msra.mxu1 %v159_v1  ;;  %v1492_v6 = vld [vmem:[%s2050_s1 + $0x38] sm:$0xff]  ;;  %s1542_s6 = sshll.u32 %s138_s29, 5 }
  0x16   : > { %1602 = vmatprep.subr.mxu0 %v1481_v2  ;;  %1609 = vmatprep.subr.mxu1 %v158_v3  ;;  %vm151_vm1 = vcmask 130048   ;;  %s141_s14 = scalar_lea.vmem %s2049_s0, %s1542_s6  ;;  %v1487_v15 = vld [vmem:[%s2050_s1 + $0x20] sm:$0xff]  ;;  %v1491_v16 = vld [vmem:[%s2050_s1 + $0x30] sm:$0xff]  ;;  %v1496_v19 = vld [vmem:[%s2050_s1 + $0x48] sm:$0xff]  ;;  %s1412_s29 = sshll.u32 %s136_s28, 4  ;;  %s2005_s29 = int_to_ptr.vmem [resolvable:$true] %s1412_s29 }
  0x17   : > { %1603 = vmatpush3.msra.mxu0 %v1481_v2  ;;  %1610 = vmatpush3.msra.mxu1 %v158_v3  ;;  %v147_v7 = vld [vmem:[%s141_s14] sm:$0xff]  ;;  %v148_v8 = vld [vmem:[%s141_s14 + $0x8] sm:$0xff]  ;;  %v149_v9 = vld [vmem:[%s141_s14 + $0x10] sm:$0xff]  ;;  %s1748_s13 = scalar_lea.vmem %s2005_s29, 256  ;;  %s1811_s6 = smov [#allocation3]  }
  0x18   : > { %1614 = vmatprep.subr.mxu0 %v1488_v5  ;;  %1621 = vmatprep.subr.mxu1 %v1492_v6  ;;  %152 = vst.msk [vmem:[#allocation2 + $0x3] sm:$0xff] %vm151_vm1, %v147_v7  ;;  %153 = vst.msk [vmem:[#allocation2 + $0xb] sm:$0xff] %vm151_vm1, %v148_v8  ;;  %v150_v10 = vld [vmem:[%s141_s14 + $0x18] sm:$0xff]  ;;  %v1495_v23 = vld [vmem:[%s2050_s1 + $0x40] sm:$0xff]  ;;  %p1749_p11 = scmp.ne.s32.totalorder %s2005_s29, %s1748_s13  ;;  %s1752_s7 = sshll.u32 %s1811_s6, 4  ;;  %s1753_s7 = int_to_ptr.vmem [resolvable:$false] %s1752_s7 }
  0x19   : > { %154 = vst.msk [vmem:[#allocation2 + $0x1b] sm:$0xff] %vm151_vm1, %v149_v9  ;;  %155 = vst.msk [vmem:[#allocation2 + $0x23] sm:$0xff] %vm151_vm1, %v150_v10  ;;  %v1500_v22 = vld [vmem:[%s2050_s1 + $0x58] sm:$0xff]  ;;  %v1499_v24 = vld [vmem:[%s2050_s1 + $0x50] sm:$0xff]  ;;  %s1754_s8 = scalar_lea.vmem %s1753_s7, 512  ;;  %p1755_p0 = scmp.lt.s32.totalorder %s2005_s29, %s1753_s7 }
  0x1a   : > { %v1504_v27 = vld [vmem:[%s2050_s1 + $0x68] sm:$0xff]  ;;  %v1508_v30 = vld [vmem:[%s2050_s1 + $0x78] sm:$0xff]  ;;  %v1503_v31 = vld [vmem:[%s2050_s1 + $0x60] sm:$0xff]  ;;  %p1750_p12 = pnand %p1749_p11, %p1867_p5  ;;  %p1756_p1 = scmp.lt.s32.totalorder %s1754_s8, %s1748_s13 }
  0x1b   : > { %v1507_v32 = vld [vmem:[%s2050_s1 + $0x70] sm:$0xff]  ;;  %v1512_v35 = vld [vmem:[%s2050_s1 + $0x88] sm:$0xff]  ;;  %v1516_v38 = vld [vmem:[%s2050_s1 + $0x98] sm:$0xff] }
  0x1c   : > { %v1511_v39 = vld [vmem:[%s2050_s1 + $0x80] sm:$0xff]  ;;  %v1515_v40 = vld [vmem:[%s2050_s1 + $0x90] sm:$0xff]  ;;  %v1520_v43 = vld [vmem:[%s2050_s1 + $0xa8] sm:$0xff]  ;;  %p1751_p13 = pneg %p1750_p12  ;;  %p1757_p2 = por %p1756_p1, %p1755_p0 }
  0x1d   : > { %v1524_v46 = vld [vmem:[%s2050_s1 + $0xb8] sm:$0xff]  ;;  %v1519_v47 = vld [vmem:[%s2050_s1 + $0xa0] sm:$0xff]  ;;  %v1523_v48 = vld [vmem:[%s2050_s1 + $0xb0] sm:$0xff] }
  0x1e   : > { %v1528_v51 = vld [vmem:[%s2050_s1 + $0xc8] sm:$0xff]  ;;  %v1532_v54 = vld [vmem:[%s2050_s1 + $0xd8] sm:$0xff]  ;;  %v1527_v55 = vld [vmem:[%s2050_s1 + $0xc0] sm:$0xff]  ;;  %p1758_p3 = pnand %p1757_p2, %p1751_p13 }
  0x1f   : > { %v160_v11 = vld [vmem:[#allocation2 + $0x1] sm:$0xff]  ;;  %v161_v13 = vld [vmem:[#allocation2 + $0x9] sm:$0xff] }
  0x20   : > { %v156_v12 = vld [vmem:[#allocation2] sm:$0xff]  ;;  %1604 = vmatprep.mubr.msk.f32.mxu0 %vm151_vm1, %v160_v11  ;;  %v157_v14 = vld [vmem:[#allocation2 + $0x8] sm:$0xff]  ;;  %v768_v34 = vld [vmem:[#allocation2 + $0x18] sm:$0xff] }
  0x21   : > { %1611 = vmatprep.mubr.msk.f32.mxu1 %vm151_vm1, %v156_v12  ;;  %1605 = vmatmul.mubr.msk.f32.vlgmr.msra.gmra.mxu0 %vm151_vm1, %v161_v13  ;;  %v327_v17 = vld [vmem:[#allocation2 + $0x2] sm:$0xff]  ;;  %v328_v20 = vld [vmem:[#allocation2 + $0xa] sm:$0xff]  ;;  %v856_v41 = vld [vmem:[#allocation2 + $0x19] sm:$0xff] }
  0x22   : > { %1612 = vmatmul.mubr.msk.f32.vlgmr.msra.gmra.mxu1 %vm151_vm1, %v157_v14  ;;  %1615 = vmatpush3.msra.mxu0 %v1488_v5  ;;  %v415_v18 = vld [vmem:[#allocation2 + $0x3] sm:$0xff]  ;;  %v416_v21 = vld [vmem:[#allocation2 + $0xb] sm:$0xff]  ;;  %v944_v42 = vld [vmem:[#allocation2 + $0x1a] sm:$0xff] }
  0x23   : > { %1622 = vmatpush3.msra.mxu1 %v1492_v6  ;;  %1616 = vmatprep.subr.mxu0 %v1487_v15  ;;  %v503_v25 = vld [vmem:[#allocation2 + $0x4] sm:$0xff]  ;;  %v504_v28 = vld [vmem:[#allocation2 + $0xc] sm:$0xff]  ;;  %v1032_v49 = vld [vmem:[#allocation2 + $0x1b] sm:$0xff] }
  0x24   : > { %1623 = vmatprep.subr.mxu1 %v1491_v16  ;;  %1617 = vmatpush3.msra.mxu0 %v1487_v15  ;;  %v591_v26 = vld [vmem:[#allocation2 + $0x5] sm:$0xff]  ;;  %v592_v29 = vld [vmem:[#allocation2 + $0xd] sm:$0xff]  ;;  %v1120_v50 = vld [vmem:[#allocation2 + $0x1c] sm:$0xff] }
  0x25   : > { %1618 = vmatprep.mubr.msk.f32.mxu0 %vm151_vm1, %v327_v17  ;;  %1624 = vmatpush3.msra.mxu1 %v1491_v16  ;;  %v679_v33 = vld [vmem:[#allocation2 + $0x6] sm:$0xff]  ;;  %v680_v36 = vld [vmem:[#allocation2 + $0xe] sm:$0xff]  ;;  %v1208_v57 = vld [vmem:[#allocation2 + $0x1d] sm:$0xff] }
  0x26   : > { %1625 = vmatprep.mubr.msk.f32.mxu1 %vm151_vm1, %v415_v18  ;;  %1628 = vmatprep.subr.mxu0 %v1496_v19  ;;  %v769_v37 = vld [vmem:[#allocation2 + $0x20] sm:$0xff]  ;;  %v1531_v56 = vld [vmem:[%s2050_s1 + $0xd0] sm:$0xff] }
  0x27   : > { %1619 = vmatmul.mubr.msk.f32.vlgmr.msra.gmra.mxu0 %vm151_vm1, %v328_v20  ;;  %1626 = vmatmul.mubr.msk.f32.vlgmr.msra.gmra.mxu1 %vm151_vm1, %v416_v21  ;;  %v857_v44 = vld [vmem:[#allocation2 + $0x21] sm:$0xff] }
  0x28   : > { %1629 = vmatpush3.msra.mxu0 %v1496_v19  ;;  %1635 = vmatprep.subr.mxu1 %v1500_v22  ;;  %v945_v45 = vld [vmem:[#allocation2 + $0x22] sm:$0xff] }
  0x29   : > { %1630 = vmatprep.subr.mxu0 %v1495_v23  ;;  %1636 = vmatpush3.msra.mxu1 %v1500_v22  ;;  %v1033_v52 = vld [vmem:[#allocation2 + $0x23] sm:$0xff] }
  0x2a   : > { %1631 = vmatpush3.msra.mxu0 %v1495_v23  ;;  %1637 = vmatprep.subr.mxu1 %v1499_v24  ;;  %v1121_v53 = vld [vmem:[#allocation2 + $0x24] sm:$0xff] }
  0x2b   : > { %1632 = vmatprep.mubr.msk.f32.mxu0 %vm151_vm1, %v503_v25  ;;  %1638 = vmatpush3.msra.mxu1 %v1499_v24  ;;  %v1296_v58 = vld [vmem:[#allocation2 + $0x1e] sm:$0xff]  ;;  %v1297_v60 = vld [vmem:[#allocation2 + $0x26] sm:$0xff] }
  0x2c   : > { %1639 = vmatprep.mubr.msk.f32.mxu1 %vm151_vm1, %v591_v26  ;;  %1642 = vmatprep.subr.mxu0 %v1504_v27  ;;  %v1209_v59 = vld [vmem:[#allocation2 + $0x25] sm:$0xff] }
  0x2d   : > { %1633 = vmatmul.mubr.msk.f32.vlgmr.msra.gmra.mxu0 %vm151_vm1, %v504_v28  ;;  %1640 = vmatmul.mubr.msk.f32.vlgmr.msra.gmra.mxu1 %vm151_vm1, %v592_v29 }
  0x2e   : > { %1643 = vmatpush3.msra.mxu0 %v1504_v27  ;;  %1649 = vmatprep.subr.mxu1 %v1508_v30 }
  0x2f   : > { %1644 = vmatprep.subr.mxu0 %v1503_v31  ;;  %1650 = vmatpush3.msra.mxu1 %v1508_v30 }
  0x30   : > { %1645 = vmatpush3.msra.mxu0 %v1503_v31  ;;  %1651 = vmatprep.subr.mxu1 %v1507_v32 }
  0x31   : > { %1646 = vmatprep.mubr.msk.f32.mxu0 %vm151_vm1, %v679_v33  ;;  %1652 = vmatpush3.msra.mxu1 %v1507_v32 }
  0x32   : > { %1653 = vmatprep.mubr.msk.f32.mxu1 %vm151_vm1, %v768_v34  ;;  %1656 = vmatprep.subr.mxu0 %v1512_v35 }
  0x33   : > { %1647 = vmatmul.mubr.msk.f32.vlgmr.msra.gmra.mxu0 %vm151_vm1, %v680_v36  ;;  %1654 = vmatmul.mubr.msk.f32.vlgmr.msra.gmra.mxu1 %vm151_vm1, %v769_v37 }
  0x34   : > { %1657 = vmatpush3.msra.mxu0 %v1512_v35  ;;  %1663 = vmatprep.subr.mxu1 %v1516_v38 }
  0x35   : > { %1658 = vmatprep.subr.mxu0 %v1511_v39  ;;  %1664 = vmatpush3.msra.mxu1 %v1516_v38 }
  0x36   : > { %1659 = vmatpush3.msra.mxu0 %v1511_v39  ;;  %1665 = vmatprep.subr.mxu1 %v1515_v40 }
  0x37   : > { %1660 = vmatprep.mubr.msk.f32.mxu0 %vm151_vm1, %v856_v41  ;;  %1666 = vmatpush3.msra.mxu1 %v1515_v40 }
  0x38   : > { %1667 = vmatprep.mubr.msk.f32.mxu1 %vm151_vm1, %v944_v42  ;;  %1670 = vmatprep.subr.mxu0 %v1520_v43 }
  0x39   : > { %1661 = vmatmul.mubr.msk.f32.vlgmr.msra.gmra.mxu0 %vm151_vm1, %v857_v44  ;;  %1668 = vmatmul.mubr.msk.f32.vlgmr.msra.gmra.mxu1 %vm151_vm1, %v945_v45 }
  0x3a   : > { %1671 = vmatpush3.msra.mxu0 %v1520_v43  ;;  %1677 = vmatprep.subr.mxu1 %v1524_v46 }
  0x3b   : > { %1672 = vmatprep.subr.mxu0 %v1519_v47  ;;  %1678 = vmatpush3.msra.mxu1 %v1524_v46 }
  0x3c   : > { %1673 = vmatpush3.msra.mxu0 %v1519_v47  ;;  %1679 = vmatprep.subr.mxu1 %v1523_v48 }
  0x3d   : > { %1674 = vmatprep.mubr.msk.f32.mxu0 %vm151_vm1, %v1032_v49  ;;  %1680 = vmatpush3.msra.mxu1 %v1523_v48 }
  0x3e   : > { %1681 = vmatprep.mubr.msk.f32.mxu1 %vm151_vm1, %v1120_v50  ;;  %1684 = vmatprep.subr.mxu0 %v1528_v51 }
  0x3f   : > { %1675 = vmatmul.mubr.msk.f32.vlgmr.msra.gmra.mxu0 %vm151_vm1, %v1033_v52  ;;  %1682 = vmatmul.mubr.msk.f32.vlgmr.msra.gmra.mxu1 %vm151_vm1, %v1121_v53 }
  0x40   : > { %1685 = vmatpush3.msra.mxu0 %v1528_v51  ;;  %1691 = vmatprep.subr.mxu1 %v1532_v54 }
  0x41   : > { %1686 = vmatprep.subr.mxu0 %v1527_v55  ;;  %1692 = vmatpush3.msra.mxu1 %v1532_v54 }
  0x42   : > { %1687 = vmatpush3.msra.mxu0 %v1527_v55  ;;  %1693 = vmatprep.subr.mxu1 %v1531_v56 }
  0x43   : > { %1688 = vmatprep.mubr.msk.f32.mxu0 %vm151_vm1, %v1208_v57  ;;  %1694 = vmatpush3.msra.mxu1 %v1531_v56 }
  0x44   : > { %1695 = vmatprep.mubr.msk.f32.mxu1 %vm151_vm1, %v1296_v58  ;;  %1689 = vmatmul.mubr.msk.f32.vlgmr.msra.gmra.mxu0 %vm151_vm1, %v1209_v59 }
  0x45   : > { %1696 = vmatmul.mubr.msk.f32.vlgmr.msra.gmra.mxu1 %vm151_vm1, %v1297_v60 }
  0xe1   : > { %v1606_v61 = vpop.f32.mrf.mxu0 }
  0xe2   : > { %v1613_v62 = vpop.f32.mrf.mxu1 }
  0xe3   : > { %v237_v63 = vpop.f32.mrf.mxu0  ;;  %v324_v1 = vadd.f32 %v1613_v62, %v1606_v61 }
  0xe4   : > { %v318_v0 = vpop.f32.mrf.mxu1 }
  0xe5   : > { %v319_v3 = vadd.f32 %v318_v0, %v237_v63 }
  0xe7   : > { %v1620_v2 = vpop.f32.mrf.mxu0  ;;  %v1627_v5 = vpop.f32.mrf.mxu1 }
  0xe8   : > { %v414_v4 = vadd.f32 %v1620_v2, %v324_v1 }
  0xe9   : > { %v404_v6 = vpop.f32.mrf.mxu0  ;;  %v492_v9 = vpop.f32.mrf.mxu1 }
  0xea   : > { %v502_v7 = vadd.f32 %v1627_v5, %v414_v4  ;;  %v413_v8 = vadd.f32 %v404_v6, %v319_v3 }
  0xec   : > { %v501_v10 = vadd.f32 %v492_v9, %v413_v8 }
  0xed   : > { %v1634_v11 = vpop.f32.mrf.mxu0  ;;  %v1641_v13 = vpop.f32.mrf.mxu1 }
  0xee   : > { %v590_v12 = vadd.f32 %v1634_v11, %v502_v7 }
  0xef   : > { %v580_v14 = vpop.f32.mrf.mxu0  ;;  %v668_v17 = vpop.f32.mrf.mxu1 }
  0xf0   : > { %v678_v15 = vadd.f32 %v1641_v13, %v590_v12  ;;  %v589_v16 = vadd.f32 %v580_v14, %v501_v10 }
  0xf2   : > { %v677_v18 = vadd.f32 %v668_v17, %v589_v16 }
  0xf3   : > { %v1648_v19 = vpop.f32.mrf.mxu0  ;;  %v1655_v21 = vpop.f32.mrf.mxu1 }
  0xf4   : > { %v766_v20 = vadd.f32 %v1648_v19, %v678_v15 }
  0xf5   : > { %v756_v22 = vpop.f32.mrf.mxu0  ;;  %v845_v25 = vpop.f32.mrf.mxu1 }
  0xf6   : > { %v855_v23 = vadd.f32 %v1655_v21, %v766_v20  ;;  %v765_v24 = vadd.f32 %v756_v22, %v677_v18 }
  0xf8   : > { %v854_v26 = vadd.f32 %v845_v25, %v765_v24 }
  0xf9   : > { %v1662_v27 = vpop.f32.mrf.mxu0  ;;  %v1669_v29 = vpop.f32.mrf.mxu1 }
  0xfa   : > { %v943_v28 = vadd.f32 %v1662_v27, %v855_v23 }
  0xfb   : > { %v933_v30 = vpop.f32.mrf.mxu0  ;;  %v1021_v33 = vpop.f32.mrf.mxu1 }
  0xfc   : > { %v1031_v31 = vadd.f32 %v1669_v29, %v943_v28  ;;  %v942_v32 = vadd.f32 %v933_v30, %v854_v26 }
  0xfe   : > { %v1030_v34 = vadd.f32 %v1021_v33, %v942_v32 }
  0xff   : > { %v1676_v35 = vpop.f32.mrf.mxu0  ;;  %v1683_v37 = vpop.f32.mrf.mxu1 }
 0x100   : > { %v1119_v36 = vadd.f32 %v1676_v35, %v1031_v31 }
 0x101   : > { %v1109_v38 = vpop.f32.mrf.mxu0  ;;  %v1197_v41 = vpop.f32.mrf.mxu1 }
 0x102   : > { %v1207_v39 = vadd.f32 %v1683_v37, %v1119_v36  ;;  %v1118_v40 = vadd.f32 %v1109_v38, %v1030_v34 }
 0x104   : > { %v1206_v42 = vadd.f32 %v1197_v41, %v1118_v40  ;;  %v1690_v43 = vpop.f32.mrf.mxu0 }
 0x105   : > { %v1697_v44 = vpop.f32.mrf.mxu1  ;;  %v1295_v45 = vadd.f32 %v1690_v43, %v1207_v39 }
 0x106   : > { %v1285_v46 = vpop.f32.mrf.mxu0 }
 0x107   : > { %v1383_v47 = vadd.f32 %v1697_v44, %v1295_v45  ;;  %v1294_v48 = vadd.f32 %v1285_v46, %v1206_v42  ;;  %v1373_v49 = vpop.f32.mrf.mxu1 }
 0x109   : > { %v1536_v50 = vmul.f32 -1.442695, %v1383_v47  ;;  %v1382_v51 = vadd.f32 %v1373_v49, %v1294_v48 }
 0x10b   : > { %1740 = vpow2.f32 %v1536_v50  ;;  %v1535_v52 = vmul.f32 -1.442695, %v1382_v51 }
 0x10d   : > { %1742 = vpow2.f32 %v1535_v52 }
 0x118   : > { %v1741_v53 = vpop.eup %1740 }
 0x119   : > { %v1391_v54 = vadd.f32 1.0, %v1741_v53 }
 0x11a   : > { %v1743_v55 = vpop.eup %1742 }
 0x11b   : > { %1744 = vrcp.f32 %v1391_v54  ;;  %v1390_v56 = vadd.f32 1.0, %v1743_v55 }
 0x11d   : > { %1746 = vrcp.f32 %v1390_v56 }
 0x128   : > { %v1745_v57 = vpop.eup %1744 }
 0x129   : > { %1397 = vst.msk [vmem:[%s136_s28 + $0x8] sm:$0xff] %vm151_vm1, %v1745_v57 }
 0x12a   : > { %v1747_v58 = vpop.eup %1746 }
 0x12b   : > { %1396 = vst.msk [vmem:[%s136_s28] sm:$0xff] %vm151_vm1, %v1747_v58 }
 0x12c   : > { %1761 = shalt.err (!%p1758_p3)
}
 0x12d   : > { %s1762_s14 = scalar_lea.hbm %s2003_s4, 256  ;;  %s1766_s21 = scalar_lea.hbm %s2051_s2, 512 }
 0x12e   : > { %p1763_p4 = scmp.ne.s32.totalorder %s2003_s4, %s1762_s14  ;;  %p1767_p9 = scmp.lt.s32.totalorder %s2003_s4, %s2051_s2 }
 0x12f   : > { %p1768_p10 = scmp.lt.s32.totalorder %s1766_s21, %s1762_s14 }
 0x130   : > { %p1764_p7 = pnand %p1763_p4, %p1867_p5 }
 0x131   : > { %p1769_p11 = por %p1768_p10, %p1767_p9 }
 0x132   : > { %p1765_p8 = pneg %p1764_p7 }
 0x134   : > { %p1770_p12 = pnand %p1769_p11, %p1765_p8 }
 0x136   : > { %1773 = shalt.err (!%p1770_p12)
}
 0x137   : > { %s1812_s24 = smov 128   ;;  %s1813_s25 = smov 8  }
 0x138   : > { %1698 = dma.vmem_to_hbm [thread:$0]  (%p1867_p5), %s2005_s29, 256, %s2003_s4, %s2009_s5, %s1812_s24, %s1812_s24, %s1813_s25  }
 0x139 PF: > { %p1704_p13 = scmp.ge.s32.totalorder %s1808_s12, 2  ;;  %s1427_s26 = sand.u32 1, %s1796_s9  }
 0x13a   : > { %s1428_s27 = scalar_lea.sflag [#allocation4], %s1427_s26 }
 0x13b   : > { %p1701_p0 = pnand %p1704_p13, %p1871_p6 }
 0x13d   : > { %p1702_p1 = pneg %p1701_p0 }
 0x13f   : > { %1791 = dma.done.wait (%p1702_p1), %s1428_s27, 256  }
 0x140   : > { %1793 = vsyncadd (%p1702_p1), %s1428_s27, 4294967040  ;;  %p12_p2 = scmp.ge.s32.totalorder %s1854_s15, 4   ;;  %s2054_s9 = smov %s1800_s10 }
 0x141   : > { %s2055_s10 = smov %s1804_s11  ;;  %s2056_s11 = smov %s1865_s18 }
 0x142   : > { %s2057_s12 = smov %s1854_s15  ;;  %14 = sbr.rel (!%p12_p2) target bundleno = 3 (0x3), region = 77 }
 0x147   :  { %1433 = vsyncpa [#allocation4], 1 }
 0x148   :  { %1435 = vsyncpa [#allocation4 + $0x1], 1 }

</bundles_post_ra>
